<compile_context>
chip_gen: v7x
topology: tpu7x:2x2x1
jax: 0.10.0
libtpu: 0.0.40
codegen_flags: <defaults>
</compile_context>

<pallas_src>
import jax
import jax.numpy as jnp
from jax import lax
from jax.experimental import pallas as pl
from jax.experimental.pallas import tpu as pltpu


def tree_decoder_kernel(x_ref, weff_ref, gb_ref, out_ref):
    """x: (B, n_clone), W_eff: (n_clone, n_site), gb: (2, n_site) = [gamma; beta]."""
    x = x_ref[...]                       # (B, n_clone)
    weff = weff_ref[...]                 # (n_clone, n_site)
    n_clone = weff_ref.shape[0]

    # z = x @ W_eff via VPU broadcast multiply-adds (K is tiny; avoid MXU).
    # Statically unrolled over the contraction dim.
    z = x[:, 0:1] * weff[0:1, :]
    for k in range(1, n_clone):
        z = z + x[:, k:k + 1] * weff[k:k + 1, :]

    # BatchNorm1d, training mode: biased batch statistics over the batch dim.
    # (Linear bias omitted — it cancels against the mean subtraction.)
    mean = jnp.mean(z, axis=0, keepdims=True)
    centered = z - mean
    var = jnp.mean(centered * centered, axis=0, keepdims=True)
    z_hat = centered * lax.rsqrt(var + 1e-5)

    gamma = gb_ref[0:1, :]
    beta = gb_ref[1:2, :]
    out_ref[...] = jax.nn.sigmoid(gamma * z_hat + beta)


def tree_decoder_forward(x, tree_pre_mask, mask, w, b, gamma, beta):
    """Matches tree_decoder.forward (training-mode BatchNorm).

    x: (B, n_clone); tree_pre_mask/mask: (n_clone, n_clone);
    w: (n_site, n_clone); b/gamma/beta: (n_site,).  `b` is accepted for API
    parity but is mathematically a no-op under batch-norm mean subtraction.
    """
    del b  # cancels exactly inside BatchNorm (training mode)
    B, n_clone = x.shape
    n_site = w.shape[0]

    # ---- Parameter-only preprocessing (per weight update, not per sample) ----
    tree = jax.nn.sigmoid(tree_pre_mask - 10.0) * mask \
        + jnp.eye(n_clone, dtype=jnp.float32)
    # W_eff = tree @ w.T, with the transpose folded into dimension_numbers.
    w_eff = lax.dot_general(tree, w, (((1,), (1,)), ((), ())),
                            preferred_element_type=jnp.float32)   # (n_clone, n_site)
    # Pack per-feature BN params into one array -> one DMA / one VMEM tile.
    gb = jnp.stack([gamma, beta], axis=0).astype(jnp.float32)     # (2, n_site)

    full = lambda shape: pl.BlockSpec(shape, lambda: (0,) * len(shape))

    return pl.pallas_call(
        tree_decoder_kernel,
        out_shape=jax.ShapeDtypeStruct((B, n_site), jnp.float32),
        in_specs=[
            full((B, n_clone)),
            full((n_clone, n_site)),
            full((2, n_site)),
        ],
        out_specs=full((B, n_site)),
        compiler_params=pltpu.CompilerParams(vmem_limit_bytes=32 << 20),
    )(x, w_eff, gb)


def reference_forward(x, tree_pre_mask, mask, w, b, gamma, beta):
    """Pure-JAX reference mirroring the PyTorch module (training-mode BN),
    including the Linear bias (to verify the in-kernel bias drop is exact)."""
    n_clone = tree_pre_mask.shape[0]
    tree = jax.nn.sigmoid(tree_pre_mask - 10.0) * mask + jnp.eye(n_clone)
    input_fc = x @ tree
    z = input_fc @ w.T + b
    mean = jnp.mean(z, axis=0, keepdims=True)
    var = jnp.mean((z - mean) ** 2, axis=0, keepdims=True)
    z_hat = (z - mean) / jnp.sqrt(var + 1e-5)
    return jax.nn.sigmoid(gamma * z_hat + beta)


if __name__ == "__main__":
    n_clone = 4
    n_site = 16
    batch = 8

    key = jax.random.PRNGKey(0)
    k_x, k_tree, k_w, k_b = jax.random.split(key, 4)

    # Inputs / parameters (deterministic, matching __init__ shapes)
    x = jax.random.normal(k_x, (batch, n_clone), dtype=jnp.float32)
    # tree_pre_mask ~ N(10, 1)
    tree_pre_mask = 10.0 + jax.random.normal(
        k_tree, (n_clone, n_clone), dtype=jnp.float32)
    # strict lower-triangular mask (tril, diagonal=-1)
    mask = jnp.tril(jnp.ones((n_clone, n_clone), dtype=jnp.float32), k=-1)
    # Linear(n_clone, n_site): weight (n_site, n_clone), bias (n_site,)
    bound = 1.0 / jnp.sqrt(jnp.float32(n_clone))
    w = jax.random.uniform(k_w, (n_site, n_clone), dtype=jnp.float32,
                           minval=-bound, maxval=bound)
    b = jax.random.uniform(k_b, (n_site,), dtype=jnp.float32,
                           minval=-bound, maxval=bound)
    # BatchNorm1d(n_site): gamma=1, beta=0 at init
    gamma = jnp.ones((n_site,), dtype=jnp.float32)
    beta = jnp.zeros((n_site,), dtype=jnp.float32)

    out = tree_decoder_forward(x, tree_pre_mask, mask, w, b, gamma, beta)
    out = jax.block_until_ready(out)

    ref = reference_forward(x, tree_pre_mask, mask, w, b, gamma, beta)
    assert out.shape == (batch, n_site)
    assert jnp.allclose(out, ref, atol=1e-5, rtol=1e-5), "mismatch vs reference"

    print("KERNEL_OK")
</pallas_src>

<mosaic_0001>
module attributes {stable_mosaic.version = 11 : i64} {
  func.func @tree_decoder_kernel(%arg0: memref<8x4xf32, #tpu.memory_space<vmem>>, %arg1: memref<4x16xf32, #tpu.memory_space<vmem>>, %arg2: memref<2x16xf32, #tpu.memory_space<vmem>>, %arg3: memref<8x16xf32, #tpu.memory_space<vmem>>) attributes {dimension_semantics = [], scalar_prefetch = 0 : i64, scratch_operands = 0 : i64, tpu.core_type = #tpu.core_type<tc>} {
    %c0 = arith.constant 0 : index
    %c0_0 = arith.constant 0 : index
    %0 = vector.load %arg0[%c0, %c0_0] : memref<8x4xf32, #tpu.memory_space<vmem>>, vector<8x4xf32>
    %c0_1 = arith.constant 0 : index
    %c0_2 = arith.constant 0 : index
    %1 = vector.load %arg1[%c0_1, %c0_2] : memref<4x16xf32, #tpu.memory_space<vmem>>, vector<4x16xf32>
    %2 = vector.extract_strided_slice %0 {offsets = [0, 0], sizes = [8, 1], strides = [1, 1]} : vector<8x4xf32> to vector<8x1xf32>
    %3 = vector.extract_strided_slice %1 {offsets = [0, 0], sizes = [1, 16], strides = [1, 1]} : vector<4x16xf32> to vector<1x16xf32>
    %4 = vector.broadcast %2 : vector<8x1xf32> to vector<8x16xf32>
    %5 = vector.broadcast %3 : vector<1x16xf32> to vector<8x16xf32>
    %6 = arith.mulf %4, %5 : vector<8x16xf32>
    %7 = vector.extract_strided_slice %0 {offsets = [0, 1], sizes = [8, 1], strides = [1, 1]} : vector<8x4xf32> to vector<8x1xf32>
    %8 = vector.extract_strided_slice %1 {offsets = [1, 0], sizes = [1, 16], strides = [1, 1]} : vector<4x16xf32> to vector<1x16xf32>
    %9 = vector.broadcast %7 : vector<8x1xf32> to vector<8x16xf32>
    %10 = vector.broadcast %8 : vector<1x16xf32> to vector<8x16xf32>
    %11 = arith.mulf %9, %10 : vector<8x16xf32>
    %12 = arith.addf %6, %11 : vector<8x16xf32>
    %13 = vector.extract_strided_slice %0 {offsets = [0, 2], sizes = [8, 1], strides = [1, 1]} : vector<8x4xf32> to vector<8x1xf32>
    %14 = vector.extract_strided_slice %1 {offsets = [2, 0], sizes = [1, 16], strides = [1, 1]} : vector<4x16xf32> to vector<1x16xf32>
    %15 = vector.broadcast %13 : vector<8x1xf32> to vector<8x16xf32>
    %16 = vector.broadcast %14 : vector<1x16xf32> to vector<8x16xf32>
    %17 = arith.mulf %15, %16 : vector<8x16xf32>
    %18 = arith.addf %12, %17 : vector<8x16xf32>
    %19 = vector.extract_strided_slice %0 {offsets = [0, 3], sizes = [8, 1], strides = [1, 1]} : vector<8x4xf32> to vector<8x1xf32>
    %20 = vector.extract_strided_slice %1 {offsets = [3, 0], sizes = [1, 16], strides = [1, 1]} : vector<4x16xf32> to vector<1x16xf32>
    %21 = vector.broadcast %19 : vector<8x1xf32> to vector<8x16xf32>
    %22 = vector.broadcast %20 : vector<1x16xf32> to vector<8x16xf32>
    %23 = arith.mulf %21, %22 : vector<8x16xf32>
    %24 = arith.addf %18, %23 : vector<8x16xf32>
    %cst = arith.constant dense<0.000000e+00> : vector<16xf32>
    %25 = vector.multi_reduction <add>, %24, %cst [0] : vector<8x16xf32> to vector<16xf32>
    %26 = vector.shape_cast %25 : vector<16xf32> to vector<1x16xf32>
    %cst_3 = arith.constant 8.000000e+00 : f32
    %27 = vector.broadcast %cst_3 : f32 to vector<1x16xf32>
    %28 = arith.divf %26, %27 : vector<1x16xf32>
    %29 = vector.broadcast %28 : vector<1x16xf32> to vector<8x16xf32>
    %30 = arith.subf %24, %29 : vector<8x16xf32>
    %31 = arith.mulf %30, %30 : vector<8x16xf32>
    %cst_4 = arith.constant dense<0.000000e+00> : vector<16xf32>
    %32 = vector.multi_reduction <add>, %31, %cst_4 [0] : vector<8x16xf32> to vector<16xf32>
    %33 = vector.shape_cast %32 : vector<16xf32> to vector<1x16xf32>
    %cst_5 = arith.constant 8.000000e+00 : f32
    %34 = vector.broadcast %cst_5 : f32 to vector<1x16xf32>
    %35 = arith.divf %33, %34 : vector<1x16xf32>
    %cst_6 = arith.constant 9.99999974E-6 : f32
    %36 = vector.broadcast %cst_6 : f32 to vector<1x16xf32>
    %37 = arith.addf %35, %36 : vector<1x16xf32>
    %38 = math.rsqrt %37 : vector<1x16xf32>
    %39 = vector.broadcast %38 : vector<1x16xf32> to vector<8x16xf32>
    %40 = arith.mulf %30, %39 : vector<8x16xf32>
    %c0_7 = arith.constant 0 : index
    %c0_8 = arith.constant 0 : index
    %41 = vector.load %arg2[%c0_7, %c0_8] : memref<2x16xf32, #tpu.memory_space<vmem>>, vector<1x16xf32>
    %c1 = arith.constant 1 : index
    %c0_9 = arith.constant 0 : index
    %42 = vector.load %arg2[%c1, %c0_9] : memref<2x16xf32, #tpu.memory_space<vmem>>, vector<1x16xf32>
    %43 = vector.broadcast %41 : vector<1x16xf32> to vector<8x16xf32>
    %44 = arith.mulf %43, %40 : vector<8x16xf32>
    %45 = vector.broadcast %42 : vector<1x16xf32> to vector<8x16xf32>
    %46 = arith.addf %44, %45 : vector<8x16xf32>
    %47 = arith.negf %46 : vector<8x16xf32>
    %48 = math.exp %47 : vector<8x16xf32>
    %cst_10 = arith.constant 1.000000e+00 : f32
    %49 = vector.broadcast %cst_10 : f32 to vector<8x16xf32>
    %50 = arith.addf %49, %48 : vector<8x16xf32>
    %51 = arith.divf %49, %50 : vector<8x16xf32>
    %c0_11 = arith.constant 0 : index
    %c0_12 = arith.constant 0 : index
    %52 = vector.load %arg3[%c0_11, %c0_12] : memref<8x16xf32, #tpu.memory_space<vmem>>, vector<8x16xf32>
    tpu.vector_store %arg3[%c0_11, %c0_12], %51 {strides = array<i32>} : memref<8x16xf32, #tpu.memory_space<vmem>>, vector<8x16xf32>,
    return
  }
}

</mosaic_0001>

<bundles_post_ra>
// kernel: tpu_custom_call.1
= control target key start
LH: loop header
LB: loop body
LE: loop exit
PB: predicated region body
PF: predicated region fallthrough
CT: control target
= control target key end

     0   :  { %v156_v1 = vmov 0   ;;  %v157_v2 = vmov 2   ;;  %s208_s0 = inlined_call_operand.vmem [shape: f32[8,4], index: 0, kind: input, shape index: {}]   ;;  %s209_s1 = inlined_call_operand.vmem [shape: f32[4,16], index: 1, kind: input, shape index: {}]   ;;  %s210_s2 = inlined_call_operand.vmem [shape: f32[2,16], index: 2, kind: input, shape index: {}]   ;;  %s211_s3 = inlined_call_operand.hbm [shape: f32[8,16], index: 3, kind: output, shape index: {}]  }
   0x1   :  { %v15_v0 = vld [vmem:[%s208_s0] sm:$0xff]  ;;  %121 = vset.pattern.permute.xlu0 %v156_v1  ;;  %123 = vset.pattern.permute.xlu1 %v157_v2 }
   0x2   :  { %8 = vsyncpa [#allocation3], 0  ;;  %19 = vperm.xlu0 %121, %v15_v0   ;;  %38 = vperm.xlu1 %123, %v15_v0   ;;  %v158_v3 = vmov 1   ;;  %v159_v4 = vmov 3   ;;  %v22_v5 = vlaneseq  ;;  %v16_v9 = vld [vmem:[%s209_s1] sm:$0xf] }
   0x3   :  { %vm57_vm0 = vcmask 130048   ;;  %v113_v47 = vld [vmem:[%s210_s2] ss:$0 sm:$0xff]  ;;  %v114_v49 = vld [vmem:[%s210_s2 + $0x1] ss:$0 sm:$0xff]  ;;  %s160_s18 = smov [#allocation2]  }
   0x4   :  { %v23_v6 = vshrl.u32 %v22_v5, 7  ;;  %s105_s19 = sshll.u32 %s160_s18, 4  ;;  %s106_s19 = int_to_ptr.vmem [resolvable:$true] %s105_s19 }
   0x5   :  { %s132_s20 = scalar_lea.vmem %s106_s19, 128  ;;  %p137_p1 = scmp.lt.s32.totalorder %s106_s19, %s106_s19 }
   0x6   :  { %122 = vset.pattern.permute.xlu0 %v158_v3  ;;  %124 = vset.pattern.permute.xlu1 %v159_v4  ;;  %v24_v7 = vsub.s32 0, %v23_v6  ;;  %v33_v8 = vsub.s32 1, %v23_v6  ;;  %v43_v11 = vsub.s32 2, %v23_v6  ;;  %v53_v13 = vsub.s32 3, %v23_v6  ;;  %p133_p0 = scmp.ne.s32.totalorder %s106_s19, %s132_s20  ;;  %p138_p2 = scmp.lt.s32.totalorder %s132_s20, %s132_s20 }
   0x7   :  { %28 = vperm.xlu0 %122, %v15_v0   ;;  %48 = vperm.xlu1 %124, %v15_v0  }
   0x8   :  { %v25_v14 = vrot.slane %v16_v9, %v24_v7  ;;  %v34_v15 = vrot.slane %v16_v9, %v33_v8  ;;  %v44_v16 = vrot.slane %v16_v9, %v43_v11  ;;  %v54_v17 = vrot.slane %v16_v9, %v53_v13  ;;  %p139_p3 = por %p138_p2, %p137_p1 }
   0xa   :  { %p140_p4 = pnand %p139_p3, %p133_p0 }
   0xb   :  { %125 = vset.pattern.permute.xlu0 %v159_v4 }
  0x81   :  { %v20_v10 = vpop.permute.xlu0 %19  ;;  %v39_v12 = vpop.permute.xlu1 %38 }
  0x82   :  { %v26_v20 = vmul.f32 %v25_v14, %v20_v10  ;;  %v45_v22 = vmul.f32 %v44_v16, %v39_v12 }
  0x86   :  { %v29_v18 = vpop.permute.xlu0 %28  ;;  %v49_v19 = vpop.permute.xlu1 %48 }
  0x87   :  { %v35_v21 = vmul.f32 %v34_v15, %v29_v18  ;;  %v55_v24 = vmul.f32 %v54_v17, %v49_v19 }
  0x89   :  { %v36_v23 = vadd.f32 %v35_v21, %v26_v20 }
  0x8b   :  { %v46_v25 = vadd.f32 %v45_v22, %v36_v23 }
  0x8d   :  { %v56_v26 = vadd.f32 %v55_v24, %v46_v25 }
  0x8f   :  { %v58_v27 = vsel %vm57_vm0, %v56_v26, 0.0 }
  0x90   :  { %v59_v28 = vrot.slane %v58_v27, 4 }
  0x92   :  { %v60_v29 = vadd.f32 %v59_v28, %v58_v27 }
  0x94   :  { %v61_v30 = vrot.slane %v60_v29, 2 }
  0x96   :  { %v62_v31 = vadd.f32 %v61_v30, %v60_v29 }
  0x98   :  { %v63_v32 = vrot.slane %v62_v31, 1 }
  0x9a   :  { %v64_v33 = vadd.f32 %v63_v32, %v62_v31 }
  0x9c   :  { %v66_v34 = vmul.f32 0.125, %v64_v33 }
  0x9e   :  { %v67_v35 = vsub.f32 %v56_v26, %v66_v34 }
  0xa0   :  { %v68_v36 = vmul.f32 %v67_v35, %v67_v35 }
  0xa2   :  { %v69_v37 = vsel %vm57_vm0, %v68_v36, 0.0 }
  0xa3   :  { %v70_v38 = vrot.slane %v69_v37, 4 }
  0xa5   :  { %v71_v39 = vadd.f32 %v70_v38, %v69_v37 }
  0xa7   :  { %v72_v40 = vrot.slane %v71_v39, 2 }
  0xa9   :  { %v73_v41 = vadd.f32 %v72_v40, %v71_v39 }
  0xab   :  { %v74_v42 = vrot.slane %v73_v41, 1 }
  0xad   :  { %v75_v43 = vadd.f32 %v74_v42, %v73_v41 }
  0xaf   :  { %v76_v44 = vmul.f32 0.125, %v75_v43 }
  0xb1   :  { %v77_v45 = vadd.f32 1e-05, %v76_v44 }
  0xb3   :  { %126 = vrsqrt.f32 %v77_v45 }
  0xbd   :  { %v127_v46 = vpop.eup %126 }
  0xbe   :  { %v79_v48 = vmul.f32 %v127_v46, %v67_v35 }
  0xc0   :  { %v86_v50 = vmul.f32 %v113_v47, %v79_v48 }
  0xc2   :  { %v91_v51 = vadd.f32 %v114_v49, %v86_v50 }
  0xc4   :  { %v115_v52 = vmul.f32 -1.442695, %v91_v51 }
  0xc6   :  { %128 = vpow2.f32 %v115_v52 }
  0xd0   :  { %v129_v53 = vpop.eup %128 }
  0xd1   :  { %v95_v54 = vadd.f32 1.0, %v129_v53 }
  0xd3   :  { %130 = vrcp.f32 %v95_v54 }
  0xdd   :  { %v131_v55 = vpop.eup %130 }
  0xde   :  { %98 = vst.msk [vmem:[#allocation2] sm:$0xff] %vm57_vm0, %v131_v55 }
  0xdf   :  { %143 = shalt.err (!%p140_p4)
}
  0xe0   :  { %s144_s22 = scalar_lea.hbm %s211_s3, 128 }
  0xe1   :  { %p145_p5 = scmp.ne.s32.totalorder %s211_s3, %s144_s22  ;;  %p148_p6 = scmp.lt.u32.totalorder %s144_s22, %s211_s3 }
  0xe3   :  { %p150_p7 = pnand %p148_p6, %p145_p5 }
  0xe5   :  { %153 = shalt.err (!%p150_p7)
}
  0xe6   :  { %108 = dma.vmem_to_hbm [thread:$0]  %s106_s19, 128, %s211_s3, [#allocation3]  }
  0xe7   :  { %154 = dma.done.wait [#allocation3], 128  }
  0xe8   :  { %155 = vsyncadd [#allocation3], 4294967168 }
  0xe9   :  { %112 = vsyncpa [#allocation3], 1 }

</bundles_post_ra>
